<compile_context>
chip_gen: v7x
topology: tpu7x:2x2x1
jax: 0.10.0
libtpu: 0.0.40
codegen_flags: <defaults>
</compile_context>

<pallas_src>
import jax
import jax.numpy as jnp
from jax.experimental import pallas as pl
from jax.experimental.pallas import tpu as pltpu

_LANE = 128    # lane width (last-dim alignment)
_SUB = 16      # bf16 sublane packing (second-to-last-dim alignment)


def _round_up(n: int, m: int) -> int:
    return ((n + m - 1) // m) * m


def _mlp_kernel(x_ref, w1_ref, b1_ref, w2_ref, b2_ref, o_ref):
    # First dense layer (bf16 inputs, f32 MXU accumulation) + bias + ReLU.
    h = jnp.dot(x_ref[...], w1_ref[...], preferred_element_type=jnp.float32)
    h = h + b1_ref[...]                       # [1, H] broadcast over batch rows
    h = jnp.maximum(h, 0.0)
    # Second dense layer.
    o = jnp.dot(h.astype(w2_ref.dtype), w2_ref[...],
                preferred_element_type=jnp.float32)
    o = o + b2_ref[...]
    o_ref[...] = o.astype(o_ref.dtype)


def network_forward(x, w1, b1, w2, b2, *, tile_b: int = 512):
    """Fused 2-layer MLP forward: relu(x @ w1 + b1) @ w2 + b2.

    x:  [B, K]        w1: [K, H]   b1: [H] or [1, H]
    w2: [H, H2]       b2: [H2] or [1, H2]
    Returns f32 [B, H2].
    """
    B, K = x.shape
    H1 = w1.shape[1]
    H2 = w2.shape[1]

    # --- pad to lane-dense / sublane-aligned shapes (zero padding is inert
    #     through matmul + bias(0-pad) + ReLU; padded output cols/rows are
    #     sliced off below).
    Kp = _round_up(K, _LANE)
    H1p = _round_up(H1, _LANE)
    H2p = _round_up(H2, _LANE)

    tb = min(tile_b, _round_up(B, _SUB))
    tb = _round_up(tb, _SUB)
    Bp = _round_up(B, tb)

    x_p = jnp.pad(x, ((0, Bp - B), (0, Kp - K))).astype(jnp.bfloat16)
    w1_p = jnp.pad(w1, ((0, Kp - K), (0, H1p - H1))).astype(jnp.bfloat16)
    w2_p = jnp.pad(w2, ((0, H1p - H1), (0, H2p - H2))).astype(jnp.bfloat16)
    b1_p = jnp.pad(b1.reshape(1, -1).astype(jnp.float32),
                   ((0, 0), (0, H1p - H1)))
    b2_p = jnp.pad(b2.reshape(1, -1).astype(jnp.float32),
                   ((0, 0), (0, H2p - H2)))

    grid = (Bp // tb,)

    flops = 2 * Bp * (Kp * H1p + H1p * H2p)
    bytes_accessed = (x_p.size * 2 + w1_p.size * 2 + w2_p.size * 2
                      + b1_p.size * 4 + b2_p.size * 4 + Bp * H2p * 4)

    out = pl.pallas_call(
        _mlp_kernel,
        out_shape=jax.ShapeDtypeStruct((Bp, H2p), jnp.float32),
        grid=grid,
        in_specs=[
            pl.BlockSpec((tb, Kp), lambda i: (i, 0)),      # x: streamed per tile
            pl.BlockSpec((Kp, H1p), lambda i: (0, 0)),     # W1: resident
            pl.BlockSpec((1, H1p), lambda i: (0, 0)),      # b1: resident
            pl.BlockSpec((H1p, H2p), lambda i: (0, 0)),    # W2: resident
            pl.BlockSpec((1, H2p), lambda i: (0, 0)),      # b2: resident
        ],
        out_specs=pl.BlockSpec((tb, H2p), lambda i: (i, 0)),
        compiler_params=pltpu.CompilerParams(
            dimension_semantics=("parallel",)),
        cost_estimate=pl.CostEstimate(
            flops=flops, transcendentals=0, bytes_accessed=bytes_accessed),
    )(x_p, w1_p, b1_p, w2_p, b2_p)

    return out[:B, :H2]


def init_params(key, input_dim, layer_neurons):
    """Deterministic parameter init (shapes implied by the module ctor)."""
    k1, k2 = jax.random.split(key)
    scale1 = 1.0 / jnp.sqrt(jnp.float32(input_dim))
    scale2 = 1.0 / jnp.sqrt(jnp.float32(layer_neurons))
    w1 = jax.random.uniform(k1, (input_dim, layer_neurons), jnp.float32,
                            -scale1, scale1)
    b1 = jnp.zeros((layer_neurons,), jnp.float32)
    w2 = jax.random.uniform(k2, (layer_neurons, layer_neurons), jnp.float32,
                            -scale2, scale2)
    b2 = jnp.zeros((layer_neurons,), jnp.float32)
    return w1, b1, w2, b2


if __name__ == "__main__":
    # Small shapes consistent with the module: input_shape=(16,), layer_neurons=32.
    batch = 64
    input_dim = 16
    layer_neurons = 32

    key = jax.random.PRNGKey(0)
    kx, kp = jax.random.split(key)
    x = jax.random.normal(kx, (batch, input_dim), jnp.float32)
    w1, b1, w2, b2 = init_params(kp, input_dim, layer_neurons)

    forward = jax.jit(network_forward)
    out = forward(x, w1, b1, w2, b2)
    jax.block_until_ready(out)

    # Pure-JAX f32 reference (kernel uses bf16 inputs -> loosened tolerance).
    ref = jnp.maximum(x @ w1 + b1[None, :], 0.0) @ w2 + b2[None, :]
    assert out.shape == (batch, layer_neurons)
    assert jnp.allclose(out, ref, atol=2e-2, rtol=2e-2), (
        float(jnp.max(jnp.abs(out - ref))))

    print("KERNEL_OK")
</pallas_src>

<mosaic_0001>
module attributes {stable_mosaic.version = 11 : i64} {
  func.func @_mlp_kernel(%arg0: i32, %arg1: memref<64x128xbf16, #tpu.memory_space<vmem>>, %arg2: memref<128x128xbf16, #tpu.memory_space<vmem>>, %arg3: memref<1x128xf32, #tpu.memory_space<vmem>>, %arg4: memref<128x128xbf16, #tpu.memory_space<vmem>>, %arg5: memref<1x128xf32, #tpu.memory_space<vmem>>, %arg6: memref<64x128xf32, #tpu.memory_space<vmem>>) attributes {dimension_semantics = [#tpu.dimension_semantics<parallel>], iteration_bounds = array<i64: 1>, scalar_prefetch = 0 : i64, scratch_operands = 0 : i64, tpu.core_type = #tpu.core_type<tc>, window_params = [{transform_indices = @transform_0, window_bounds = array<i64: 64, 128>}, {pipeline_mode = #tpu.pipeline_mode<synchronous>, transform_indices = @transform_1, window_bounds = array<i64: 128, 128>}, {pipeline_mode = #tpu.pipeline_mode<synchronous>, transform_indices = @transform_2, window_bounds = array<i64: 1, 128>}, {pipeline_mode = #tpu.pipeline_mode<synchronous>, transform_indices = @transform_3, window_bounds = array<i64: 128, 128>}, {pipeline_mode = #tpu.pipeline_mode<synchronous>, transform_indices = @transform_4, window_bounds = array<i64: 1, 128>}, {transform_indices = @transform_5, window_bounds = array<i64: 64, 128>}]} {
    %c0 = arith.constant 0 : index
    %c0_0 = arith.constant 0 : index
    %0 = vector.load %arg1[%c0, %c0_0] : memref<64x128xbf16, #tpu.memory_space<vmem>>, vector<64x128xbf16>
    %c0_1 = arith.constant 0 : index
    %c0_2 = arith.constant 0 : index
    %1 = vector.load %arg2[%c0_1, %c0_2] : memref<128x128xbf16, #tpu.memory_space<vmem>>, vector<128x128xbf16>
    %cst = arith.constant dense<0.000000e+00> : vector<64x128xf32>
    %2 = tpu.matmul %0, %1, %cst {dimension_numbers = #tpu.dot_dimension_numbers<[1], [0], [0], [1], [0, 0, 1, 1], [], []>} : vector<64x128xbf16>, vector<128x128xbf16>, vector<64x128xf32> -> vector<64x128xf32>
    %c0_3 = arith.constant 0 : index
    %c0_4 = arith.constant 0 : index
    %3 = vector.load %arg3[%c0_3, %c0_4] : memref<1x128xf32, #tpu.memory_space<vmem>>, vector<1x128xf32>
    %4 = vector.broadcast %3 : vector<1x128xf32> to vector<64x128xf32>
    %5 = arith.addf %2, %4 : vector<64x128xf32>
    %cst_5 = arith.constant 0.000000e+00 : f32
    %6 = vector.broadcast %cst_5 : f32 to vector<64x128xf32>
    %7 = arith.maximumf %5, %6 : vector<64x128xf32>
    %8 = arith.truncf %7 : vector<64x128xf32> to vector<64x128xbf16>
    %c0_6 = arith.constant 0 : index
    %c0_7 = arith.constant 0 : index
    %9 = vector.load %arg4[%c0_6, %c0_7] : memref<128x128xbf16, #tpu.memory_space<vmem>>, vector<128x128xbf16>
    %cst_8 = arith.constant dense<0.000000e+00> : vector<64x128xf32>
    %10 = tpu.matmul %8, %9, %cst_8 {dimension_numbers = #tpu.dot_dimension_numbers<[1], [0], [0], [1], [0, 0, 1, 1], [], []>} : vector<64x128xbf16>, vector<128x128xbf16>, vector<64x128xf32> -> vector<64x128xf32>
    %c0_9 = arith.constant 0 : index
    %c0_10 = arith.constant 0 : index
    %11 = vector.load %arg5[%c0_9, %c0_10] : memref<1x128xf32, #tpu.memory_space<vmem>>, vector<1x128xf32>
    %12 = vector.broadcast %11 : vector<1x128xf32> to vector<64x128xf32>
    %13 = arith.addf %10, %12 : vector<64x128xf32>
    %c0_11 = arith.constant 0 : index
    %c0_12 = arith.constant 0 : index
    %14 = vector.load %arg6[%c0_11, %c0_12] : memref<64x128xf32, #tpu.memory_space<vmem>>, vector<64x128xf32>
    tpu.vector_store %arg6[%c0_11, %c0_12], %13 {strides = array<i32>} : memref<64x128xf32, #tpu.memory_space<vmem>>, vector<64x128xf32>,
    return
  }
  func.func @transform_0(%arg0: i32) -> (i32, i32) {
    %c0_i32 = arith.constant 0 : i32
    %c0_i32_0 = arith.constant 0 : i32
    return %arg0, %c0_i32 : i32, i32
  }
  func.func @transform_1(%arg0: i32) -> (i32, i32) {
    %c0_i32 = arith.constant 0 : i32
    %c0_i32_0 = arith.constant 0 : i32
    %c0_i32_1 = arith.constant 0 : i32
    return %c0_i32, %c0_i32_0 : i32, i32
  }
  func.func @transform_2(%arg0: i32) -> (i32, i32) {
    %c0_i32 = arith.constant 0 : i32
    %c0_i32_0 = arith.constant 0 : i32
    %c0_i32_1 = arith.constant 0 : i32
    return %c0_i32, %c0_i32_0 : i32, i32
  }
  func.func @transform_3(%arg0: i32) -> (i32, i32) {
    %c0_i32 = arith.constant 0 : i32
    %c0_i32_0 = arith.constant 0 : i32
    %c0_i32_1 = arith.constant 0 : i32
    return %c0_i32, %c0_i32_0 : i32, i32
  }
  func.func @transform_4(%arg0: i32) -> (i32, i32) {
    %c0_i32 = arith.constant 0 : i32
    %c0_i32_0 = arith.constant 0 : i32
    %c0_i32_1 = arith.constant 0 : i32
    return %c0_i32, %c0_i32_0 : i32, i32
  }
  func.func @transform_5(%arg0: i32) -> (i32, i32) {
    %c0_i32 = arith.constant 0 : i32
    %c0_i32_0 = arith.constant 0 : i32
    return %arg0, %c0_i32 : i32, i32
  }
}

</mosaic_0001>

<bundles_post_ra>
// kernel: network_forward.1
= control target key start
LH: loop header
LB: loop body
LE: loop exit
PB: predicated region body
PF: predicated region fallthrough
CT: control target
= control target key end

     0   :  { %s583_s1 = inlined_call_operand.vmem [shape: bf16[128,128], index: 1, kind: input, shape index: {}]   ;;  %s584_s0 = inlined_call_operand.vmem [shape: bf16[64,128], index: 0, kind: input, shape index: {}]   ;;  %s585_s3 = inlined_call_operand.vmem [shape: bf16[128,128], index: 3, kind: input, shape index: {}]   ;;  %s586_s2 = inlined_call_operand.vmem [shape: f32[1,128], index: 2, kind: input, shape index: {}]   ;;  %s587_s4 = inlined_call_operand.vmem [shape: f32[1,128], index: 4, kind: input, shape index: {}]   ;;  %s588_s5 = inlined_call_operand.vmem [shape: f32[64,128], index: 5, kind: output, shape index: {}]  }
   0x1   :  { %v443_v0 = vld [vmem:[%s583_s1] sm:$0xff]   ;;  %v444_v1 = vld [vmem:[%s583_s1 + $0x8] sm:$0xff]   ;;  %v445_v2 = vld [vmem:[%s583_s1 + $0x10] sm:$0xff]  }
   0x2   :  { %395 = vmatprep.subr.bf16.mxu0 %v443_v0  ;;  %v446_v3 = vld [vmem:[%s583_s1 + $0x18] sm:$0xff]   ;;  %v451_v4 = vld [vmem:[%s584_s0] sm:$0xff]   ;;  %v456_v7 = vld [vmem:[%s585_s3 + $0x8] sm:$0xff]  }
   0x3   :  { %396 = vmatpush3.bf16.msra.mxu0 %v443_v0  ;;  %411 = vmatprep.mubr.bf16.mxu0 %v451_v4  ;;  %v447_v5 = vld [vmem:[%s583_s1 + $0x20] sm:$0xff]   ;;  %v448_v8 = vld [vmem:[%s583_s1 + $0x28] sm:$0xff]   ;;  %v457_v9 = vld [vmem:[%s585_s3 + $0x10] sm:$0xff]  }
   0x4   :  { %397 = vmatprep.subr.bf16.mxu0 %v444_v1  ;;  %v455_v6 = vld [vmem:[%s585_s3] sm:$0xff]   ;;  %v449_v10 = vld [vmem:[%s583_s1 + $0x30] sm:$0xff]   ;;  %v458_v11 = vld [vmem:[%s585_s3 + $0x18] sm:$0xff]  }
   0x5   :  { %419 = vmatprep.subr.bf16.mxu1 %v455_v6  ;;  %v450_v12 = vld [vmem:[%s583_s1 + $0x38] sm:$0xff]   ;;  %v459_v13 = vld [vmem:[%s585_s3 + $0x20] sm:$0xff]   ;;  %v460_v14 = vld [vmem:[%s585_s3 + $0x28] sm:$0xff]  }
   0x6   :  { %420 = vmatpush3.bf16.msra.mxu1 %v455_v6  ;;  %v452_v15 = vld [vmem:[%s584_s0 + $0x8] sm:$0xff]   ;;  %v453_v16 = vld [vmem:[%s584_s0 + $0x10] sm:$0xff]   ;;  %v454_v17 = vld [vmem:[%s584_s0 + $0x18] sm:$0xff]  }
   0x7   :  { %398 = vmatpush3.bf16.msra.mxu0 %v444_v1  ;;  %421 = vmatprep.subr.bf16.mxu1 %v456_v7  ;;  %v461_v18 = vld [vmem:[%s585_s3 + $0x30] sm:$0xff]   ;;  %v462_v19 = vld [vmem:[%s585_s3 + $0x38] sm:$0xff]   ;;  %v349_v20 = vld [vmem:[%s586_s2] ss:$0 sm:$0xff] }
   0x8   :  { %399 = vmatprep.subr.bf16.mxu0 %v445_v2  ;;  %v362_v49 = vld [vmem:[%s587_s4] ss:$0 sm:$0xff] }
   0xa   :  { %422 = vmatpush3.bf16.msra.mxu1 %v456_v7 }
   0xb   :  { %400 = vmatpush3.bf16.msra.mxu0 %v445_v2  ;;  %423 = vmatprep.subr.bf16.mxu1 %v457_v9 }
   0xc   :  { %401 = vmatprep.subr.bf16.mxu0 %v446_v3 }
   0xe   :  { %424 = vmatpush3.bf16.msra.mxu1 %v457_v9 }
   0xf   :  { %402 = vmatpush3.bf16.msra.mxu0 %v446_v3  ;;  %425 = vmatprep.subr.bf16.mxu1 %v458_v11 }
  0x10   :  { %403 = vmatprep.subr.bf16.mxu0 %v447_v5 }
  0x12   :  { %426 = vmatpush3.bf16.msra.mxu1 %v458_v11 }
  0x13   :  { %404 = vmatpush3.bf16.msra.mxu0 %v447_v5  ;;  %427 = vmatprep.subr.bf16.mxu1 %v459_v13 }
  0x14   :  { %405 = vmatprep.subr.bf16.mxu0 %v448_v8 }
  0x16   :  { %428 = vmatpush3.bf16.msra.mxu1 %v459_v13 }
  0x17   :  { %406 = vmatpush3.bf16.msra.mxu0 %v448_v8  ;;  %429 = vmatprep.subr.bf16.mxu1 %v460_v14 }
  0x18   :  { %407 = vmatprep.subr.bf16.mxu0 %v449_v10 }
  0x1a   :  { %430 = vmatpush3.bf16.msra.mxu1 %v460_v14 }
  0x1b   :  { %408 = vmatpush3.bf16.msra.mxu0 %v449_v10  ;;  %431 = vmatprep.subr.bf16.mxu1 %v461_v18 }
  0x1c   :  { %409 = vmatprep.subr.bf16.mxu0 %v450_v12 }
  0x1e   :  { %432 = vmatpush3.bf16.msra.mxu1 %v461_v18 }
  0x1f   :  { %410 = vmatpush3.bf16.msra.mxu0 %v450_v12  ;;  %433 = vmatprep.subr.bf16.mxu1 %v462_v19 }
  0x22   :  { %412 = vmatmul.mubr.bf16.vlgmr.msra.gmra.mrb[0].mxu0 %v452_v15  ;;  %434 = vmatpush3.bf16.msra.mxu1 %v462_v19 }
  0x23   :  { %415 = vmatprep.mubr.bf16.mxu0 %v453_v16 }
  0x2a   :  { %416 = vmatmul.mubr.bf16.gmra.mrb[4].mxu0 %v454_v17 }
  0xf5   :  { %v413_v21 = vpop.f32.mrb[0].mxu0 }
  0xf6   :  { %v167_v22 = vadd.f32 %v413_v21, %v349_v20  ;;  %v158_v23 = vpop.f32.mrb[1].mxu0 }
  0xf7   :  { %v159_v24 = vadd.f32 %v349_v20, %v158_v23  ;;  %v414_v25 = vpop.f32.mrb[2].mxu0 }
  0xf8   :  { %v170_v26 = vadd.f32 %v414_v25, %v349_v20  ;;  %v161_v27 = vpop.f32.mrb[3].mxu0  ;;  %v191_v29 = vmax.f32 %v167_v22, 0.0 }
  0xf9   :  { %v162_v28 = vadd.f32 %v349_v20, %v161_v27  ;;  %v189_v31 = vmax.f32 %v159_v24, 0.0 }
  0xfa   :  { %v192_v30 = vmax.f32 %v170_v26, 0.0 }
  0xfb   :  { %v190_v32 = vmax.f32 %v162_v28, 0.0 }
  0xfc   :  { %v198_v33 = vpack.c.bf16 %v192_v30, %v191_v29 }
  0xfd   :  { %v417_v34 = vpop.f32.mrb[4].mxu0  ;;  %v197_v35 = vpack.c.bf16 %v190_v32, %v189_v31 }
  0xfe   :  { %v183_v36 = vadd.f32 %v417_v34, %v349_v20  ;;  %v174_v37 = vpop.f32.mrb[5].mxu0 }
  0xff   :  { %v175_v38 = vadd.f32 %v349_v20, %v174_v37  ;;  %v418_v39 = vpop.f32.mrb[6].mxu0  ;;  %435 = vmatprep.mubr.bf16.mxu1 %v197_v35 }
 0x100   :  { %v186_v40 = vadd.f32 %v418_v39, %v349_v20  ;;  %v177_v41 = vpop.f32.mrb[7].mxu0  ;;  %436 = vmatmul.mubr.bf16.vlgmr.msra.gmra.mrb[0].mxu1 %v198_v33  ;;  %v195_v43 = vmax.f32 %v183_v36, 0.0 }
 0x101   :  { %v178_v42 = vadd.f32 %v349_v20, %v177_v41  ;;  %v193_v45 = vmax.f32 %v175_v38, 0.0 }
 0x102   :  { %v196_v44 = vmax.f32 %v186_v40, 0.0 }
 0x103   :  { %v194_v46 = vmax.f32 %v178_v42, 0.0 }
 0x104   :  { %v200_v47 = vpack.c.bf16 %v196_v44, %v195_v43 }
 0x105   :  { %v199_v48 = vpack.c.bf16 %v194_v46, %v193_v45 }
 0x107   :  { %439 = vmatprep.mubr.bf16.mxu1 %v199_v48 }
 0x108   :  { %440 = vmatmul.mubr.bf16.gmra.mrb[4].mxu1 %v200_v47 }
 0x1d3   :  { %v437_v50 = vpop.f32.mrb[0].mxu1 }
 0x1d4   :  { %v315_v51 = vadd.f32 %v437_v50, %v362_v49  ;;  %v306_v52 = vpop.f32.mrb[1].mxu1 }
 0x1d5   :  { %v307_v53 = vadd.f32 %v362_v49, %v306_v52  ;;  %v438_v54 = vpop.f32.mrb[2].mxu1 }
 0x1d6   :  { %339 = vst [vmem:[%s588_s5 + $0x10] sm:$0xff] %v315_v51  ;;  %v318_v55 = vadd.f32 %v438_v54, %v362_v49  ;;  %v309_v56 = vpop.f32.mrb[3].mxu1 }
 0x1d7   :  { %337 = vst [vmem:[%s588_s5] sm:$0xff] %v307_v53  ;;  %v310_v57 = vadd.f32 %v362_v49, %v309_v56 }
 0x1d8   :  { %340 = vst [vmem:[%s588_s5 + $0x18] sm:$0xff] %v318_v55 }
 0x1d9   :  { %338 = vst [vmem:[%s588_s5 + $0x8] sm:$0xff] %v310_v57 }
 0x1db   :  { %v441_v58 = vpop.f32.mrb[4].mxu1 }
 0x1dc   :  { %v331_v59 = vadd.f32 %v441_v58, %v362_v49  ;;  %v322_v60 = vpop.f32.mrb[5].mxu1 }
 0x1dd   :  { %v323_v61 = vadd.f32 %v362_v49, %v322_v60  ;;  %v442_v62 = vpop.f32.mrb[6].mxu1 }
 0x1de   :  { %343 = vst [vmem:[%s588_s5 + $0x30] sm:$0xff] %v331_v59  ;;  %v334_v63 = vadd.f32 %v442_v62, %v362_v49  ;;  %v325_v0 = vpop.f32.mrb[7].mxu1 }
 0x1df   :  { %341 = vst [vmem:[%s588_s5 + $0x20] sm:$0xff] %v323_v61  ;;  %v326_v1 = vadd.f32 %v362_v49, %v325_v0 }
 0x1e0   :  { %344 = vst [vmem:[%s588_s5 + $0x38] sm:$0xff] %v334_v63 }
 0x1e1   :  { %342 = vst [vmem:[%s588_s5 + $0x28] sm:$0xff] %v326_v1 }

</bundles_post_ra>
